<compile_context>
chip_gen: v6e
topology: v6e:2x2x1
jax: 0.10.0
libtpu: 0.0.40
codegen_flags: <defaults>
</compile_context>

<pallas_src>
import functools

import jax
import jax.numpy as jnp
from jax.experimental import pallas as pl
from jax.experimental.pallas import tpu as pltpu


def _round_up(n, m):
    return ((n + m - 1) // m) * m


def _lr_conv_kernel(x_ref, w_ref, o_ref, *, t_tile, n_q):
    """One (batch, time-tile) grid step.

    x_ref: (rows_per_tile, stride*C)  phase-grouped input slab (incl. halo)
    w_ref: (n_q, stride*C, 2*C)       fused block-diagonal left/right weights
    o_ref: (t_tile, 2*C)              output block = [left_feats | right_feats]
    """
    acc = jnp.zeros((t_tile, o_ref.shape[-1]), jnp.float32)
    for q in range(n_q):                              # static, unrolled
        lhs = x_ref[pl.ds(q, t_tile), :]              # contiguous sublane slice
        acc = acc + jnp.dot(lhs, w_ref[q], preferred_element_type=jnp.float32)
    o_ref[...] = acc.astype(o_ref.dtype)              # single full-width store


def left_right_feature_extractor(x, w_left, w_right, *, kernel_size, stride,
                                 t_tile=512, compute_dtype=None):
    """x: (B, C, T); w_*: (C_out=C, C_in=C, K).  Returns (B, T_out, 2*C)."""
    b, c, t = x.shape
    k, s = kernel_size, stride
    out_dtype = x.dtype
    if compute_dtype is None:
        compute_dtype = x.dtype

    t_out = (t - 1) // s + 1
    t_tile = max(8, min(_round_up(t_tile, 8), _round_up(t_out, 8)))
    n_tiles = pl.cdiv(t_out, t_tile)
    t_out_pad = n_tiles * t_tile

    # Conv taps span phase-grouped row offsets 0 .. 2k//s  (left taps 0..k-1,
    # right taps k+1..2k on the un-grouped time axis).
    n_q = (2 * k) // s + 1
    rows_per_tile = _round_up(t_tile + n_q - 1, 8)

    # ---- host-side glue (cheap, ~1x the input size) --------------------------
    # TODO(synk): replicate padding / halo tiling stays as host-side indexing
    # rather than an in-kernel manual DMA of raw x.
    xt = jnp.transpose(x, (0, 2, 1))                       # (B, T, C) time-major

    # x_tiles[b, tile, r, p*C + cc] = x[b, cc, clip((tile*t_tile + r)*s + p - k, 0, T-1)]
    tile_ids = jnp.arange(n_tiles)[:, None, None]
    row_ids = jnp.arange(rows_per_tile)[None, :, None]
    phase_ids = jnp.arange(s)[None, None, :]
    time_idx = (tile_ids * t_tile + row_ids) * s + phase_ids - k
    time_idx = jnp.clip(time_idx, 0, t - 1)                # replicate padding
    x_tiles = xt[:, time_idx, :]                           # (B, nt, rows, s, C)
    x_tiles = x_tiles.reshape(b, n_tiles, rows_per_tile, s * c)
    x_tiles = x_tiles.astype(compute_dtype)

    # Fused block-diagonal weights:
    #   W_big[q, p*C:(p+1)*C, :C]  <- left  tap d = q*s + p        (d < k)
    #   W_big[q, p*C:(p+1)*C, C:]  <- right tap d - (k+1)          (k < d <= 2k)
    wl_t = jnp.transpose(w_left, (2, 1, 0))                # (K, C_in, C_out)
    wr_t = jnp.transpose(w_right, (2, 1, 0))
    w_big = jnp.zeros((n_q, s * c, 2 * c), jnp.float32)
    for d in range(k):                                     # left taps
        q, p = divmod(d, s)
        w_big = w_big.at[q, p * c:(p + 1) * c, 0:c].set(wl_t[d])
    for d in range(k):                                     # right taps
        q, p = divmod(d + k + 1, s)
        w_big = w_big.at[q, p * c:(p + 1) * c, c:2 * c].set(wr_t[d])
    w_big = w_big.astype(compute_dtype)

    # ---- pallas call ----------------------------------------------------------
    kernel = functools.partial(_lr_conv_kernel, t_tile=t_tile, n_q=n_q)
    in_itemsize = jnp.dtype(compute_dtype).itemsize
    cost = pl.CostEstimate(
        flops=2 * b * t_out_pad * n_q * (s * c) * (2 * c),
        transcendentals=0,
        bytes_accessed=int(x_tiles.size * in_itemsize + w_big.size * in_itemsize
                           + b * t_out_pad * 2 * c * jnp.dtype(out_dtype).itemsize),
    )

    out = pl.pallas_call(
        kernel,
        out_shape=jax.ShapeDtypeStruct((b, t_out_pad, 2 * c), out_dtype),
        grid=(b, n_tiles),
        in_specs=[
            pl.BlockSpec((pl.Squeezed(), pl.Squeezed(), rows_per_tile, s * c),
                         lambda bb, tt: (bb, tt, 0, 0)),
            pl.BlockSpec((n_q, s * c, 2 * c), lambda bb, tt: (0, 0, 0)),
        ],
        out_specs=pl.BlockSpec((pl.Squeezed(), t_tile, 2 * c),
                               lambda bb, tt: (bb, tt, 0)),
        compiler_params=pltpu.CompilerParams(
            dimension_semantics=("parallel", "parallel"),
            vmem_limit_bytes=32 * 1024 * 1024),
        cost_estimate=cost,
    )(x_tiles, w_big)
    return out[:, :t_out, :]


def _reference(x, w_left, w_right, kernel_size, stride):
    """Pure-JAX reference mirroring the PyTorch forward."""
    k = kernel_size
    left_edge = jnp.repeat(x[:, :, :1], k, axis=2)
    right_edge = jnp.repeat(x[:, :, -1:], k, axis=2)
    x_pad_l = jnp.concatenate([left_edge, x], axis=2)[:, :, :-1]
    x_pad_r = jnp.concatenate([x, right_edge], axis=2)[:, :, 1:]
    dn = jax.lax.conv_dimension_numbers(x_pad_l.shape, w_left.shape,
                                        ('NCH', 'OIH', 'NCH'))
    lf = jax.lax.conv_general_dilated(x_pad_l, w_left, (stride,), 'VALID',
                                      dimension_numbers=dn)
    rf = jax.lax.conv_general_dilated(x_pad_r, w_right, (stride,), 'VALID',
                                      dimension_numbers=dn)
    feats = jnp.concatenate([lf, rf], axis=1)       # (B, 2C, T_out)
    return jnp.transpose(feats, (0, 2, 1))          # (B, T_out, 2C)


if __name__ == "__main__":
    key = jax.random.PRNGKey(0)
    kx, kl, kr = jax.random.split(key, 3)

    b, dim = 2, 32
    kernel_size, stride = 3, 2
    bound = 1.0 / (dim * kernel_size) ** 0.5
    w_left = jax.random.uniform(kl, (dim, dim, kernel_size), jnp.float32, -bound, bound)
    w_right = jax.random.uniform(kr, (dim, dim, kernel_size), jnp.float32, -bound, bound)

    # --- check 1: small module-sized shapes, f32 compute, single tile ---------
    t = 16
    x = jax.random.normal(kx, (b, dim, t), dtype=jnp.float32)
    out = jax.block_until_ready(left_right_feature_extractor(
        x, w_left, w_right, kernel_size=kernel_size, stride=stride))
    ref = _reference(x, w_left, w_right, kernel_size, stride)
    t_out = (t - 1) // stride + 1
    assert out.shape == (b, t_out, 2 * dim), out.shape
    assert jnp.allclose(out, ref, atol=1e-4, rtol=1e-4)

    # --- check 2: longer sequence -> multi-tile grid + bf16 compute path ------
    t2 = 200
    x2 = jax.random.normal(jax.random.PRNGKey(1), (b, dim, t2), dtype=jnp.float32)
    out2 = jax.block_until_ready(left_right_feature_extractor(
        x2, w_left, w_right, kernel_size=kernel_size, stride=stride,
        t_tile=32, compute_dtype=jnp.bfloat16))
    ref2 = _reference(x2, w_left, w_right, kernel_size, stride)
    t_out2 = (t2 - 1) // stride + 1
    assert out2.shape == (b, t_out2, 2 * dim), out2.shape
    assert jnp.allclose(out2, ref2, atol=5e-2, rtol=5e-2)

    print("KERNEL_OK")
</pallas_src>

<mosaic_0001>
module attributes {stable_mosaic.version = 11 : i64} {
  func.func @_lr_conv_kernel(%arg0: i32, %arg1: i32, %arg2: memref<1x1x16x64xf32, #tpu.memory_space<vmem>>, %arg3: memref<4x64x64xf32, #tpu.memory_space<vmem>>, %arg4: memref<1x8x64xf32, #tpu.memory_space<vmem>>) attributes {dimension_semantics = [#tpu.dimension_semantics<parallel>, #tpu.dimension_semantics<parallel>], iteration_bounds = array<i64: 2, 1>, scalar_prefetch = 0 : i64, scratch_operands = 0 : i64, tpu.core_type = #tpu.core_type<tc>, window_params = [{transform_indices = @transform_0, window_bounds = array<i64: 1, 1, 16, 64>}, {pipeline_mode = #tpu.pipeline_mode<synchronous>, transform_indices = @transform_1, window_bounds = array<i64: 4, 64, 64>}, {transform_indices = @transform_2, window_bounds = array<i64: 1, 8, 64>}]} {
    %cst = arith.constant 0.000000e+00 : f32
    %0 = vector.broadcast %cst : f32 to vector<8x64xf32>
    %c0 = arith.constant 0 : index
    %c0_0 = arith.constant 0 : index
    %c0_1 = arith.constant 0 : index
    %c0_2 = arith.constant 0 : index
    %1 = vector.load %arg2[%c0, %c0_0, %c0_1, %c0_2] : memref<1x1x16x64xf32, #tpu.memory_space<vmem>>, vector<1x1x8x64xf32>
    %2 = vector.shape_cast %1 : vector<1x1x8x64xf32> to vector<8x64xf32>
    %c0_3 = arith.constant 0 : index
    %c0_4 = arith.constant 0 : index
    %c0_5 = arith.constant 0 : index
    %3 = vector.load %arg3[%c0_3, %c0_4, %c0_5] : memref<4x64x64xf32, #tpu.memory_space<vmem>>, vector<1x64x64xf32>
    %4 = vector.shape_cast %3 : vector<1x64x64xf32> to vector<64x64xf32>
    %cst_6 = arith.constant dense<0.000000e+00> : vector<8x64xf32>
    %5 = tpu.matmul %2, %4, %cst_6 {dimension_numbers = #tpu.dot_dimension_numbers<[1], [0], [0], [1], [0, 0, 1, 1], [], []>} : vector<8x64xf32>, vector<64x64xf32>, vector<8x64xf32> -> vector<8x64xf32>
    %6 = arith.addf %0, %5 : vector<8x64xf32>
    %c0_7 = arith.constant 0 : index
    %c0_8 = arith.constant 0 : index
    %c1 = arith.constant 1 : index
    %c0_9 = arith.constant 0 : index
    %7 = vector.load %arg2[%c0_7, %c0_8, %c1, %c0_9] : memref<1x1x16x64xf32, #tpu.memory_space<vmem>>, vector<1x1x8x64xf32>
    %8 = vector.shape_cast %7 : vector<1x1x8x64xf32> to vector<8x64xf32>
    %c1_10 = arith.constant 1 : index
    %c0_11 = arith.constant 0 : index
    %c0_12 = arith.constant 0 : index
    %9 = vector.load %arg3[%c1_10, %c0_11, %c0_12] : memref<4x64x64xf32, #tpu.memory_space<vmem>>, vector<1x64x64xf32>
    %10 = vector.shape_cast %9 : vector<1x64x64xf32> to vector<64x64xf32>
    %cst_13 = arith.constant dense<0.000000e+00> : vector<8x64xf32>
    %11 = tpu.matmul %8, %10, %cst_13 {dimension_numbers = #tpu.dot_dimension_numbers<[1], [0], [0], [1], [0, 0, 1, 1], [], []>} : vector<8x64xf32>, vector<64x64xf32>, vector<8x64xf32> -> vector<8x64xf32>
    %12 = arith.addf %6, %11 : vector<8x64xf32>
    %c0_14 = arith.constant 0 : index
    %c0_15 = arith.constant 0 : index
    %c2 = arith.constant 2 : index
    %c0_16 = arith.constant 0 : index
    %13 = vector.load %arg2[%c0_14, %c0_15, %c2, %c0_16] : memref<1x1x16x64xf32, #tpu.memory_space<vmem>>, vector<1x1x8x64xf32>
    %14 = vector.shape_cast %13 : vector<1x1x8x64xf32> to vector<8x64xf32>
    %c2_17 = arith.constant 2 : index
    %c0_18 = arith.constant 0 : index
    %c0_19 = arith.constant 0 : index
    %15 = vector.load %arg3[%c2_17, %c0_18, %c0_19] : memref<4x64x64xf32, #tpu.memory_space<vmem>>, vector<1x64x64xf32>
    %16 = vector.shape_cast %15 : vector<1x64x64xf32> to vector<64x64xf32>
    %cst_20 = arith.constant dense<0.000000e+00> : vector<8x64xf32>
    %17 = tpu.matmul %14, %16, %cst_20 {dimension_numbers = #tpu.dot_dimension_numbers<[1], [0], [0], [1], [0, 0, 1, 1], [], []>} : vector<8x64xf32>, vector<64x64xf32>, vector<8x64xf32> -> vector<8x64xf32>
    %18 = arith.addf %12, %17 : vector<8x64xf32>
    %c0_21 = arith.constant 0 : index
    %c0_22 = arith.constant 0 : index
    %c3 = arith.constant 3 : index
    %c0_23 = arith.constant 0 : index
    %19 = vector.load %arg2[%c0_21, %c0_22, %c3, %c0_23] : memref<1x1x16x64xf32, #tpu.memory_space<vmem>>, vector<1x1x8x64xf32>
    %20 = vector.shape_cast %19 : vector<1x1x8x64xf32> to vector<8x64xf32>
    %c3_24 = arith.constant 3 : index
    %c0_25 = arith.constant 0 : index
    %c0_26 = arith.constant 0 : index
    %21 = vector.load %arg3[%c3_24, %c0_25, %c0_26] : memref<4x64x64xf32, #tpu.memory_space<vmem>>, vector<1x64x64xf32>
    %22 = vector.shape_cast %21 : vector<1x64x64xf32> to vector<64x64xf32>
    %cst_27 = arith.constant dense<0.000000e+00> : vector<8x64xf32>
    %23 = tpu.matmul %20, %22, %cst_27 {dimension_numbers = #tpu.dot_dimension_numbers<[1], [0], [0], [1], [0, 0, 1, 1], [], []>} : vector<8x64xf32>, vector<64x64xf32>, vector<8x64xf32> -> vector<8x64xf32>
    %24 = arith.addf %18, %23 : vector<8x64xf32>
    %c0_28 = arith.constant 0 : index
    %c0_29 = arith.constant 0 : index
    %c0_30 = arith.constant 0 : index
    %25 = vector.load %arg4[%c0_28, %c0_29, %c0_30] : memref<1x8x64xf32, #tpu.memory_space<vmem>>, vector<1x8x64xf32>
    %26 = vector.shape_cast %25 : vector<1x8x64xf32> to vector<8x64xf32>
    %27 = vector.shape_cast %24 : vector<8x64xf32> to vector<1x8x64xf32>
    tpu.vector_store %arg4[%c0_28, %c0_29, %c0_30], %27 {strides = array<i32>} : memref<1x8x64xf32, #tpu.memory_space<vmem>>, vector<1x8x64xf32>,
    return
  }
  func.func @transform_0(%arg0: i32, %arg1: i32) -> (i32, i32, i32, i32) {
    %c0_i32 = arith.constant 0 : i32
    %c0_i32_0 = arith.constant 0 : i32
    %c0_i32_1 = arith.constant 0 : i32
    return %arg0, %arg1, %c0_i32, %c0_i32_0 : i32, i32, i32, i32
  }
  func.func @transform_1(%arg0: i32, %arg1: i32) -> (i32, i32, i32) {
    %c0_i32 = arith.constant 0 : i32
    %c0_i32_0 = arith.constant 0 : i32
    %c0_i32_1 = arith.constant 0 : i32
    %c0_i32_2 = arith.constant 0 : i32
    return %c0_i32, %c0_i32_0, %c0_i32_1 : i32, i32, i32
  }
  func.func @transform_2(%arg0: i32, %arg1: i32) -> (i32, i32, i32) {
    %c0_i32 = arith.constant 0 : i32
    %c0_i32_0 = arith.constant 0 : i32
    return %arg0, %arg1, %c0_i32 : i32, i32, i32
  }
}

</mosaic_0001>

<bundles_post_ra>
// kernel: tpu_custom_call.1
= control target key start
LH: loop header
LB: loop body
LE: loop exit
PB: predicated region body
PF: predicated region fallthrough
CT: control target
= control target key end

     0   :  { %7 = vsyncpa [#allocation3], 0  ;;  %s1234_s0 = inlined_call_operand.hbm [shape: f32[2,1,16,64], index: 0, kind: input, shape index: {}]   ;;  %s1235_s1 = inlined_call_operand.hbm [shape: f32[4,64,64], index: 1, kind: input, shape index: {}]   ;;  %s1236_s2 = inlined_call_operand.hbm [shape: f32[2,8,64], index: 2, kind: output, shape index: {}]  }
   0x1   :  { %9 = vsyncpa [#allocation3 + $0x1], 0 }
   0x2   :  { %10 = vsyncpa [#allocation6], 0 }
   0x3   :  { %11 = vsyncpa [#allocation4], 0 }
   0x4   :  { %13 = vsyncpa [#allocation4 + $0x1], 0  ;;  %s1009_s9 = smov 0   ;;  %s1011_s10 = smov 0  }
   0x5   :  { %s1013_s11 = smov 0   ;;  %s1015_s12 = smov 0  }
   0x6   :  { %s1017_s13 = smov 0   ;;  %s1019_s14 = smov 0  }
   0x7 LB: > { %s637_s15 = sadd.s32 4294967295, %s985_s14   ;;  %s638_s16 = sadd.s32 4294967294, %s985_s14   ;;  %s985_s14 = sphi %s1019_s14, %s19_s14   ;;  %s981_s13 = sphi %s1017_s13, %s1256_s13   ;;  %s977_s12 = sphi %s1015_s12, %s1255_s12   ;;  %s973_s11 = sphi %s1013_s11, %s1254_s11   ;;  %s969_s10 = sphi %s1011_s10, %s1253_s10   ;;  %s965_s9 = sphi %s1009_s9, %s1252_s9  }
   0x8   : > { %p53_p0 = scmp.ne.s32.totalorder %s969_s10, %s965_s9  ;;  %p1043_p1 = scmp.eq.s32.totalorder %s637_s15, 0 }
   0x9   : > { %p1047_p2 = scmp.eq.s32.totalorder %s637_s15, 1  ;;  %p106_p3 = scmp.eq.s32.totalorder %s638_s16, 1 }
   0xa   : > { %p1053_p4 = por %p1043_p1, %p53_p0  ;;  %p639_p5 = scmp.ge.s32.totalorder %s985_s14, 1 }
   0xb   : > { %p1058_p6 = por %p106_p3, %p53_p0  ;;  %p113_p7 = scmp.lt.s32.totalorder %s985_s14, 3 }
   0xc   : > { %s1241_s19 = scalar_select %p1053_p4, 1, 0 }
   0xd   : > { %s1242_s20 = scalar_select %p1058_p6, 1, 0 }
   0xe   : > { %p1063_p8 = pnand %p639_p5, %p113_p7  ;;  %s987_s22 = smov [#allocation5]  }
   0xf   : > { %s125_s23 = sshll.u32 %s987_s22, 4  ;;  %s31_s25 = sadd.s32 1, %s981_s13  ;;  %s126_s23 = int_to_ptr.vmem [resolvable:$true] %s125_s23 }
  0x10   : > { %p778_p9 = pneg %p1063_p8  ;;  %s858_s26 = scalar_lea.vmem %s126_s23, 4096 }
  0x11   : > { %p859_p13 = scmp.ne.s32.totalorder %s126_s23, %s858_s26  ;;  %p866_p5 = scmp.lt.s32.totalorder %s126_s23, %s126_s23 }
  0x12   : > { %p1072_p11 = pnand %p778_p9, %p1043_p1  ;;  %p867_p7 = scmp.lt.s32.totalorder %s858_s26, %s858_s26 }
  0x14   : > { %p849_p12 = pneg %p1072_p11  ;;  %p868_p6 = por %p867_p7, %p866_p5 }
  0x16   : > { %p861_p0 = pnand %p859_p13, %p849_p12 }
  0x18   : > { %p862_p3 = pneg %p861_p0 }
  0x1a   : > { %p869_p4 = pnand %p868_p6, %p862_p3 }
  0x1c   : > { %872 = shalt.err (!%p869_p4)
}
  0x1d   : > { %s1238_s27 = smov 128   ;;  %s989_s28 = smov 8  }
  0x1e   : > { %781 = dma.hbm_to_vmem [thread:$0]  (!%p1072_p11), %s1235_s1, 4096, %s126_s23, [#allocation6], %s1238_s27, %s1238_s27, %s989_s28  }
  0x1f   : > { %p33_p4 = scmp.ge.s32.totalorder %s31_s25, 2  ;;  %s40_s3 = sadd.s32 1, %s973_s11 }
  0x20   : > { %p47_p6 = scmp.ne.s32.totalorder %s973_s11, %s969_s10  ;;  %p48_p9 = scmp.eq.s32.totalorder %s985_s14, 0 }
  0x21   : > { %s1258_s25 = smov (%p33_p4, %s31_s25), 0  ;;  %p791_p0 = scmp.lt.s32.totalorder %s985_s14, 2 }
  0x22   : > { %p1093_p12 = por %p48_p9, %p47_p6  ;;  %p1099_p13 = por %p1047_p2, %p47_p6 }
  0x23   : > { %s35_s6 = ssub.s32 %s981_s13, %s1258_s25  ;;  %s139_s7 = sand.u32 1, %s973_s11  }
  0x24   : > { %p38_p11 = scmp.eq.s32.totalorder %s35_s6, 0  ;;  %s642_s8 = sshll.u32 %s139_s7, 4 }
  0x25   : > { %s657_s16 = sshll.u32 %s981_s13, 8  ;;  %s143_s26 = scalar_lea.vmem [#allocation2], %s642_s8 }
  0x26   : > { %s1108_s15 = scalar_select %p38_p11, %s973_s11, %s40_s3  }
  0x27   : > { %s151_s24 = scalar_lea.hbm %s1234_s0, %s657_s16  ;;  %s152_s29 = sshll.u32 %s143_s26, 4  ;;  %s153_s29 = int_to_ptr.vmem [resolvable:$true] %s152_s29 }
  0x28   : > { %p1116_p2 = pnand %p791_p0, %p1093_p12  ;;  %s140_s30 = scalar_lea.sflag [#allocation3], %s139_s7 }
  0x29   : > { %s886_s6 = scalar_lea.vmem %s153_s29, 256  ;;  %s990_s3 = smov [#allocation2]  }
  0x2a   : > { %p875_p3 = pneg %p1116_p2  ;;  %p887_p5 = scmp.ne.s32.totalorder %s153_s29, %s886_s6 }
  0x2b   : > { %s891_s27 = sshll.u32 %s990_s3, 4  ;;  %s892_s27 = int_to_ptr.vmem [resolvable:$false] %s891_s27 }
  0x2c   : > { %p889_p7 = pnand %p887_p5, %p875_p3  ;;  %s893_s16 = scalar_lea.vmem %s892_s27, 512 }
  0x2d   : > { %p894_p6 = scmp.lt.s32.totalorder %s153_s29, %s892_s27  ;;  %p895_p9 = scmp.lt.s32.totalorder %s893_s16, %s886_s6 }
  0x2e   : > { %p890_p4 = pneg %p889_p7 }
  0x2f   : > { %p896_p11 = por %p895_p9, %p894_p6 }
  0x31   : > { %p897_p10 = pnand %p896_p11, %p890_p4 }
  0x33   : > { %900 = shalt.err (!%p897_p10)
}
  0x34   : > { %s1248_s4 = smov 128   ;;  %164 = sbr.rel (%p1063_p8) target bundleno = 306 (0x132), region = 28 }
  0x35   : > { %785 = dma.hbm_to_vmem [thread:$0]  (!%p1116_p2), %s151_s24, 256, %s153_s29, %s140_s30, %s1248_s4, %s1248_s4, %s989_s28  }
  0x36   : > { %s1130_s7 = sand.u32 (!%p1063_p8), 1, %s969_s10   ;;  %p1249_p10 = scmp.ne.s32.totalorder (!%p1063_p8), %s1241_s19, 0 }
  0x37   : > { %s646_s27 = sshll.u32 (!%p1063_p8), %s1130_s7, 4  ;;  %s167_s8 = scalar_lea.sflag (!%p1063_p8), [#allocation3], %s1130_s7 }
  0x38   : > { %s1134_s22 = scalar_lea.vmem (!%p1063_p8), [#allocation2], %s646_s27 }
  0x39   : > { %952 = dma.done.wait (%p1249_p10), %s167_s8, 256  }
  0x3a   : > { %954 = vsyncadd (%p1249_p10), %s167_s8, 4294967040 }
  0x3b   : > { %956 = dma.done.wait (%p1043_p1), [#allocation6], 4096  }
  0x3c   : > { %958 = vsyncadd (%p1043_p1), [#allocation6], 4294963200  ;;  %v991_v0 = vmov 0.0   ;;  %vm992_vm0 = vmmov 0   ;;  %v213_v1 = vld [vmem:[#allocation5 + $0x78] sm:$0xff]  ;;  %v212_v3 = vld [vmem:[#allocation5 + $0x70] sm:$0xff] }
  0x3d   : > { %694 = vmatprep.subr.mxu0 %v991_v0  ;;  %713 = vmatprep.subr.mxu1 %v991_v0  ;;  %v203_v2 = vld [vmem:[#allocation5 + $0x38] sm:$0xff]  ;;  %v202_v4 = vld [vmem:[#allocation5 + $0x30] sm:$0xff]  ;;  %v211_v5 = vld [vmem:[#allocation5 + $0x68] sm:$0xff]  ;;  %vm214_vm1 = vcmask 523264   ;;  %s648_s17 = sshll.u32 %s1130_s7, 3  ;;  %s654_s19 = sshll.u32 %s977_s12, 7 }
  0x3e   : > { %710 = vmatprep.mubr.msk.f32.mxu0 %vm992_vm0, %v991_v0  ;;  %729 = vmatprep.mubr.msk.f32.mxu1 %vm992_vm0, %v991_v0  ;;  %v201_v6 = vld [vmem:[#allocation5 + $0x28] sm:$0xff]  ;;  %v210_v7 = vld [vmem:[#allocation5 + $0x60] sm:$0xff]  ;;  %v209_v9 = vld [vmem:[#allocation5 + $0x58] sm:$0xff]  ;;  %s194_s21 = scalar_lea.vmem [#allocation7], %s648_s17  ;;  %s543_s26 = scalar_lea.hbm %s1236_s2, %s654_s19 }
  0x3f   : > { %695 = vmatpush3.msra.mxu0 %v213_v1  ;;  %714 = vmatpush3.msra.mxu1 %v203_v2  ;;  %v200_v8 = vld [vmem:[#allocation5 + $0x20] sm:$0xff]  ;;  %v199_v10 = vld [vmem:[#allocation5 + $0x18] sm:$0xff]  ;;  %v208_v11 = vld [vmem:[#allocation5 + $0x50] sm:$0xff]  ;;  %s545_s28 = sshll.u32 %s194_s21, 4  ;;  %s531_s29 = scalar_lea.sflag [#allocation4], %s1130_s7  ;;  %s546_s28 = int_to_ptr.vmem [resolvable:$true] %s545_s28 }
  0x40   : > { %696 = vmatprep.subr.mxu0 %v991_v0  ;;  %715 = vmatprep.subr.mxu1 %v991_v0  ;;  %v198_v12 = vld [vmem:[#allocation5 + $0x10] sm:$0xff]  ;;  %v207_v13 = vld [vmem:[#allocation5 + $0x48] sm:$0xff]  ;;  %v206_v15 = vld [vmem:[#allocation5 + $0x40] sm:$0xff]  ;;  %s901_s18 = scalar_lea.vmem %s546_s28, 128  ;;  %s993_s12 = smov [#allocation7]  }
  0x41   : > { %697 = vmatpush3.msra.mxu0 %v212_v3  ;;  %716 = vmatpush3.msra.mxu1 %v202_v4  ;;  %v197_v14 = vld [vmem:[#allocation5 + $0x8] sm:$0xff]  ;;  %v196_v16 = vld [vmem:[#allocation5] sm:$0xff]  ;;  %v370_v19 = vld [vmem:[#allocation5 + $0xb8] sm:$0xff]  ;;  %p902_p1 = scmp.ne.s32.totalorder %s546_s28, %s901_s18  ;;  %s905_s30 = sshll.u32 %s993_s12, 4  ;;  %s906_s30 = int_to_ptr.vmem [resolvable:$false] %s905_s30 }
  0x42   : > { %698 = vmatprep.subr.mxu0 %v991_v0  ;;  %717 = vmatprep.subr.mxu1 %v991_v0  ;;  %v204_v17 = vld [vmem:[%s1134_s22 + $0x1] sm:$0xff]  ;;  %s907_s6 = scalar_lea.vmem %s906_s30, 256  ;;  %p908_p0 = scmp.lt.s32.totalorder %s546_s28, %s906_s30 }
  0x43   : > { %699 = vmatpush3.msra.mxu0 %v211_v5  ;;  %718 = vmatpush3.msra.mxu1 %v201_v6  ;;  %v195_v18 = vld [vmem:[%s1134_s22] sm:$0xff]  ;;  %v454_v20 = vld [vmem:[#allocation5 + $0xf8] sm:$0xff]  ;;  %v368_v23 = vld [vmem:[#allocation5 + $0xa8] sm:$0xff]  ;;  %p903_p8 = pnand %p902_p1, %p1099_p13  ;;  %p909_p2 = scmp.lt.s32.totalorder %s907_s6, %s901_s18 }
  0x44   : > { %700 = vmatprep.subr.mxu0 %v991_v0  ;;  %719 = vmatprep.subr.mxu1 %v991_v0  ;;  %v369_v21 = vld [vmem:[#allocation5 + $0xb0] sm:$0xff]  ;;  %v452_v24 = vld [vmem:[#allocation5 + $0xe8] sm:$0xff]  ;;  %v367_v25 = vld [vmem:[#allocation5 + $0xa0] sm:$0xff] }
  0x45   : > { %701 = vmatpush3.msra.mxu0 %v210_v7  ;;  %720 = vmatpush3.msra.mxu1 %v200_v8  ;;  %v453_v22 = vld [vmem:[#allocation5 + $0xf0] sm:$0xff]  ;;  %v451_v26 = vld [vmem:[#allocation5 + $0xe0] sm:$0xff]  ;;  %v366_v27 = vld [vmem:[#allocation5 + $0x98] sm:$0xff]  ;;  %p904_p12 = pneg %p903_p8  ;;  %p910_p3 = por %p909_p2, %p908_p0 }
  0x46   : > { %702 = vmatprep.subr.mxu0 %v991_v0  ;;  %721 = vmatprep.subr.mxu1 %v991_v0  ;;  %v450_v28 = vld [vmem:[#allocation5 + $0xd8] sm:$0xff]  ;;  %v365_v29 = vld [vmem:[#allocation5 + $0x90] sm:$0xff]  ;;  %v364_v31 = vld [vmem:[#allocation5 + $0x88] sm:$0xff] }
  0x47   : > { %703 = vmatpush3.msra.mxu0 %v209_v9  ;;  %722 = vmatpush3.msra.mxu1 %v199_v10  ;;  %v449_v30 = vld [vmem:[#allocation5 + $0xd0] sm:$0xff]  ;;  %v448_v32 = vld [vmem:[#allocation5 + $0xc8] sm:$0xff]  ;;  %v363_v33 = vld [vmem:[#allocation5 + $0x80] sm:$0xff]  ;;  %p911_p5 = pnand %p910_p3, %p904_p12 }
  0x48   : > { %704 = vmatprep.subr.mxu0 %v991_v0  ;;  %723 = vmatprep.subr.mxu1 %v991_v0  ;;  %v447_v34 = vld [vmem:[#allocation5 + $0xc0] sm:$0xff] }
  0x49   : > { %705 = vmatpush3.msra.mxu0 %v208_v11  ;;  %724 = vmatpush3.msra.mxu1 %v198_v12  ;;  %v361_v35 = vld [vmem:[%s1134_s22 + $0x2] sm:$0xff] }
  0x4a   : > { %706 = vmatprep.subr.mxu0 %v991_v0  ;;  %725 = vmatprep.subr.mxu1 %v991_v0  ;;  %v445_v36 = vld [vmem:[%s1134_s22 + $0x3] sm:$0xff] }
  0x4b   : > { %707 = vmatpush3.msra.mxu0 %v207_v13  ;;  %726 = vmatpush3.msra.mxu1 %v197_v14 }
  0x4c   : > { %708 = vmatprep.subr.mxu0 %v991_v0  ;;  %727 = vmatprep.subr.mxu1 %v991_v0 }
  0x4d   : > { %709 = vmatpush3.msra.mxu0 %v206_v15  ;;  %728 = vmatpush3.msra.mxu1 %v196_v16 }
  0x4e   : > { %711 = vmatmul.mubr.msk.f32.vlgmr.msra.gmra.mxu0 %vm214_vm1, %v204_v17  ;;  %732 = vmatprep.subr.mxu0 %v991_v0 }
  0x4f   : > { %751 = vmatprep.subr.mxu1 %v991_v0  ;;  %730 = vmatmul.mubr.msk.f32.vlgmr.msra.gmra.mxu1 %vm214_vm1, %v195_v18 }
  0x50   : > { %733 = vmatpush3.msra.mxu0 %v370_v19  ;;  %752 = vmatpush3.msra.mxu1 %v454_v20 }
  0x51   : > { %734 = vmatprep.subr.mxu0 %v991_v0  ;;  %753 = vmatprep.subr.mxu1 %v991_v0 }
  0x52   : > { %735 = vmatpush3.msra.mxu0 %v369_v21  ;;  %754 = vmatpush3.msra.mxu1 %v453_v22 }
  0x53   : > { %736 = vmatprep.subr.mxu0 %v991_v0  ;;  %755 = vmatprep.subr.mxu1 %v991_v0 }
  0x54   : > { %737 = vmatpush3.msra.mxu0 %v368_v23  ;;  %756 = vmatpush3.msra.mxu1 %v452_v24 }
  0x55   : > { %738 = vmatprep.subr.mxu0 %v991_v0  ;;  %757 = vmatprep.subr.mxu1 %v991_v0 }
  0x56   : > { %739 = vmatpush3.msra.mxu0 %v367_v25  ;;  %758 = vmatpush3.msra.mxu1 %v451_v26 }
  0x57   : > { %740 = vmatprep.subr.mxu0 %v991_v0  ;;  %759 = vmatprep.subr.mxu1 %v991_v0 }
  0x58   : > { %741 = vmatpush3.msra.mxu0 %v366_v27  ;;  %760 = vmatpush3.msra.mxu1 %v450_v28 }
  0x59   : > { %742 = vmatprep.subr.mxu0 %v991_v0  ;;  %761 = vmatprep.subr.mxu1 %v991_v0 }
  0x5a   : > { %743 = vmatpush3.msra.mxu0 %v365_v29  ;;  %762 = vmatpush3.msra.mxu1 %v449_v30 }
  0x5b   : > { %744 = vmatprep.subr.mxu0 %v991_v0  ;;  %763 = vmatprep.subr.mxu1 %v991_v0 }
  0x5c   : > { %745 = vmatpush3.msra.mxu0 %v364_v31  ;;  %764 = vmatpush3.msra.mxu1 %v448_v32 }
  0x5d   : > { %746 = vmatprep.subr.mxu0 %v991_v0  ;;  %765 = vmatprep.subr.mxu1 %v991_v0 }
  0x5e   : > { %747 = vmatpush3.msra.mxu0 %v363_v33  ;;  %748 = vmatprep.mubr.msk.f32.mxu0 %vm992_vm0, %v991_v0 }
  0x5f   : > { %766 = vmatpush3.msra.mxu1 %v447_v34  ;;  %767 = vmatprep.mubr.msk.f32.mxu1 %vm992_vm0, %v991_v0 }
  0x60   : > { %749 = vmatmul.mubr.msk.f32.vlgmr.msra.gmra.mxu0 %vm214_vm1, %v361_v35  ;;  %768 = vmatmul.mubr.msk.f32.vlgmr.msra.gmra.mxu1 %vm214_vm1, %v445_v36 }
 0x10e   : > { %v284_v37 = vpop.f32.mrf.mxu0 }
 0x10f   : > { %v357_v38 = vpop.f32.mrf.mxu1 }
 0x110   : > { %v712_v39 = vpop.f32.mrf.mxu0  ;;  %v358_v41 = vadd.f32 %v357_v38, %v284_v37 }
 0x111   : > { %v731_v40 = vpop.f32.mrf.mxu1 }
 0x120   : > { %v440_v42 = vpop.f32.mrf.mxu0  ;;  %v524_v43 = vpop.f32.mrf.mxu1 }
 0x121   : > { %v444_v44 = vadd.f32 %v440_v42, %v358_v41 }
 0x122   : > { %v750_v45 = vpop.f32.mrf.mxu0  ;;  %v769_v46 = vpop.f32.mrf.mxu1 }
 0x123   : > { %v528_v47 = vadd.f32 %v524_v43, %v444_v44 }
 0x125   : > { %529 = vst.msk [vmem:[%s194_s21] sm:$0xff] %vm214_vm1, %v528_v47 }
 0x126   : > { %914 = shalt.err (!%p911_p5)
}
 0x127   : > { %s915_s3 = scalar_lea.hbm %s543_s26, 128  ;;  %s919_s7 = scalar_lea.hbm %s1236_s2, 256 }
 0x128   : > { %p916_p7 = scmp.ne.s32.totalorder %s543_s26, %s915_s3  ;;  %p920_p9 = scmp.lt.s32.totalorder %s543_s26, %s1236_s2 }
 0x129   : > { %p921_p11 = scmp.lt.s32.totalorder %s919_s7, %s915_s3 }
 0x12a   : > { %p917_p4 = pnand %p916_p7, %p1099_p13 }
 0x12b   : > { %p922_p10 = por %p921_p11, %p920_p9 }
 0x12c   : > { %p918_p6 = pneg %p917_p4 }
 0x12e   : > { %p923_p1 = pnand %p922_p10, %p918_p6 }
 0x130   : > { %926 = shalt.err (!%p923_p1)
}
 0x131   : > { %776 = dma.vmem_to_hbm [thread:$0]  (%p1099_p13), %s546_s28, 128, %s543_s26, %s531_s29  }
 0x132 PF: > { %s557_s22 = sand.u32 1, %s965_s9   ;;  %p1250_p8 = scmp.ne.s32.totalorder %s1242_s20, 0 }
 0x133   : > { %p1251_p12 = scmp.ge.s32.totalorder %s985_s14, 2  ;;  %s558_s17 = scalar_lea.sflag [#allocation4], %s557_s22 }
 0x135   : > { %p787_p0 = pnand %p1251_p12, %p1250_p8 }
 0x137   : > { %p788_p2 = pneg %p787_p0 }
 0x139   : > { %960 = dma.done.wait (%p788_p2), %s558_s17, 128  }
 0x13a   : > { %962 = vsyncadd (%p788_p2), %s558_s17, 4294967168  ;;  %s19_s14 = sadd.s32 1, %s985_s14   ;;  %s1252_s9 = smov %s969_s10 }
 0x13b   : > { %p16_p3 = scmp.ge.s32.totalorder %s19_s14, 4   ;;  %s1253_s10 = smov %s973_s11 }
 0x13c   : > { %s1254_s11 = smov %s1108_s15  ;;  %s1255_s12 = smov %s981_s13 }
 0x13d   : > { %s1256_s13 = smov %s1258_s25  ;;  %18 = sbr.rel (!%p16_p3) target bundleno = 7 (0x7), region = 80 }
 0x142   :  { %563 = vsyncpa [#allocation3], 1 }
 0x143   :  { %565 = vsyncpa [#allocation3 + $0x1], 1 }
 0x144   :  { %566 = vsyncpa [#allocation6], 1 }
 0x145   :  { %567 = vsyncpa [#allocation4], 1 }
 0x146   :  { %569 = vsyncpa [#allocation4 + $0x1], 1 }

</bundles_post_ra>
